<compile_context>
chip_gen: v7x
topology: tpu7x:2x2x1
jax: 0.10.0
libtpu: 0.0.40
codegen_flags: <defaults>
</compile_context>

<pallas_src>
import functools

import jax
import jax.numpy as jnp
from jax import lax
from jax.experimental import pallas as pl
from jax.experimental.pallas import tpu as pltpu


def _conv3x3_kernel(TB, C, W, H, x_ref, w_ref, b_ref, o_ref, xpad_ref):
    """3x3 'same' conv, 1 input channel, C output channels, TB images/step.

    x_ref    : (TB, H, W)       f32 VMEM -- raw images (natural H, W layout)
    w_ref    : (C*9,)           f32 SMEM -- flattened [c, kh, kw] conv taps
    b_ref    : (C,)             f32 SMEM
    o_ref    : (TB, C, W, H)    f32 VMEM -- conv output (transposed spatial)
    xpad_ref : (TB, W+2, H+2)   f32 VMEM -- zero-padded transposed block
    """
    # Zero the padded scratch, then overwrite only its interior; the 1-px
    # border that is left zero implements the 'same' padding.  Re-zeroed every
    # step (NOT guarded on program_id == 0) so the border is valid on every
    # TensorCore when the batch grid axis is split across cores.
    xpad_ref[...] = jnp.zeros_like(xpad_ref)

    # One batched in-VMEM H<->W swap per grid step replaces
    # torch.transpose(images, 3, 1): no per-image transposes, no HBM pass.
    xt = jnp.swapaxes(x_ref[...].astype(jnp.float32), 1, 2)       # (TB, W, H)
    xpad_ref[:, 1:W + 1, 1:H + 1] = xt                             # interior

    # Load the padded block ONCE; the 9 shifted 3x3 windows are value slices
    # of this single load and are reused by every output channel.
    xpad = xpad_ref[...]                                           # (TB, W+2, H+2)
    planes = [xpad[:, kh:kh + W, kw:kw + H]                        # (TB, W, H)
              for kh in range(3) for kw in range(3)]

    # Hoist every SMEM scalar read (C*9 taps + C biases) out of the loops so
    # each splat is issued exactly once per grid step.
    taps = [w_ref[i] for i in range(C * 9)]
    biases = [b_ref[c] for c in range(C)]

    for c in range(C):
        acc = planes[0] * taps[c * 9]          # init from first tap (no zeros)
        for t in range(1, 9):
            acc = acc + planes[t] * taps[c * 9 + t]
        o_ref[:, c, :, :] = (acc + biases[c]).astype(o_ref.dtype)


def _round_up(v, m):
    return -(-v // m) * m


def _tile_bytes(shape, itemsize=4):
    """VMEM footprint of an f32 tile including (8, 128) sublane/lane padding."""
    lead = 1
    for d in shape[:-2]:
        lead *= d
    return lead * _round_up(shape[-2], 8) * _round_up(shape[-1], 128) * itemsize


def _chip_tuning():
    """Returns (vmem_budget_bytes, want_multi_step, vmem_limit_bytes)."""
    vmem_capacity = None
    try:
        vmem_capacity = pltpu.get_tpu_info().vmem_capacity_bytes
    except Exception:  # unknown chip / host tracing: fall back conservative
        vmem_capacity = None
    if vmem_capacity is not None and vmem_capacity >= 96 * 1024 * 1024:
        # v5e / v6e: 1 TensorCore, 128 MiB VMEM -> single biggest block,
        # larger scoped-VMEM limit (defaults are only 16 / 32 MiB).
        return 32 * 1024 * 1024, False, 64 * 1024 * 1024
    # v7x (64 MiB VMEM, 2 TensorCores) or unknown: conservative budget and
    # keep >= 2 grid steps so both cores get work under "parallel" semantics.
    return 8 * 1024 * 1024, True, 32 * 1024 * 1024


def _pick_block_batch(n, c, w, h, vmem_budget_bytes, want_multi_step,
                      max_tb=32):
    """Largest batch block dividing n that fits the padded-VMEM budget
    (double-buffered in+out blocks + the batched pad scratch)."""
    per_image = (2 * (_tile_bytes((1, h, w)) + _tile_bytes((1, c, w, h)))
                 + _tile_bytes((1, w + 2, h + 2)))
    cap = max(1, min(max_tb, vmem_budget_bytes // per_image, n))
    divisors = [d for d in range(1, cap + 1) if n % d == 0]
    if want_multi_step:
        multi = [d for d in divisors if n // d >= 2]
        if multi:
            return max(multi)
    return max(divisors)


def input_projection_forward(images, weight, bias, *, block_batch=None):
    """images: (N, H, W, 1); weight: (C, 1, 3, 3); bias: (C,) -> (N, C, W, H)."""
    N, H, W, cin = images.shape
    assert cin == 1, "InputProjectionLayer expects a single input channel"
    C = weight.shape[0]

    # Free views only -- no wrapper-side transpose / pad / extra HBM passes.
    x = images.reshape(N, H, W)
    w_flat = weight.astype(jnp.float32).reshape(C * 9)   # [c, kh, kw] order
    b_flat = bias.astype(jnp.float32)

    vmem_budget, want_multi, vmem_limit = _chip_tuning()
    if block_batch is None:
        tb = _pick_block_batch(N, C, W, H, vmem_budget, want_multi)
    else:
        # User-supplied block that does not divide N: fall back to the largest
        # divisor not exceeding it instead of asserting.
        tb = max(d for d in range(1, min(block_batch, N) + 1) if N % d == 0)
    assert N % tb == 0

    kernel = functools.partial(_conv3x3_kernel, tb, C, W, H)

    out = pl.pallas_call(
        kernel,
        out_shape=jax.ShapeDtypeStruct((N, C, W, H), images.dtype),
        grid_spec=pltpu.PrefetchScalarGridSpec(
            num_scalar_prefetch=0,
            grid=(N // tb,),
            in_specs=[
                pl.BlockSpec((tb, H, W), lambda i: (i, 0, 0)),
                pl.BlockSpec(memory_space=pltpu.MemorySpace.SMEM),
                pl.BlockSpec(memory_space=pltpu.MemorySpace.SMEM),
            ],
            out_specs=pl.BlockSpec((tb, C, W, H), lambda i: (i, 0, 0, 0)),
            scratch_shapes=[pltpu.VMEM((tb, W + 2, H + 2), jnp.float32)],
        ),
        compiler_params=pltpu.CompilerParams(
            dimension_semantics=("parallel",),
            vmem_limit_bytes=vmem_limit,
        ),
    )(x, w_flat, b_flat)
    return out


def _reference_forward(images, weight, bias):
    """Pure-JAX reference mirroring the PyTorch module."""
    x = jnp.transpose(images, (0, 3, 2, 1))  # (N, 1, W, H)
    out = lax.conv_general_dilated(
        x, weight,
        window_strides=(1, 1),
        padding="SAME",
        dimension_numbers=("NCHW", "OIHW", "NCHW"),
    )
    return out + bias.reshape(1, -1, 1, 1)


if __name__ == "__main__":
    key = jax.random.PRNGKey(0)

    def _run_case(case_key, n, h, w, c):
        k_img, k_w, k_b = jax.random.split(case_key, 3)
        # Input images (N, H, W, 1) -- the module transposes dims 3 and 1.
        images = jax.random.normal(k_img, (n, h, w, 1), dtype=jnp.float32)
        # Deterministic synthetic Conv2d(1, C, 3x3) parameters (fan_in = 9).
        bound = 1.0 / 3.0
        weight = jax.random.uniform(k_w, (c, 1, 3, 3), minval=-bound,
                                    maxval=bound, dtype=jnp.float32)
        bias = jax.random.uniform(k_b, (c,), minval=-bound, maxval=bound,
                                  dtype=jnp.float32)

        out = jax.block_until_ready(
            input_projection_forward(images, weight, bias))
        ref = jax.block_until_ready(_reference_forward(images, weight, bias))

        assert out.shape == (n, c, w, h), out.shape
        assert jnp.allclose(out, ref, atol=1e-5, rtol=1e-5), (
            float(jnp.max(jnp.abs(out - ref))))

    k1, k2 = jax.random.split(key)
    _run_case(k1, n=2, h=16, w=16, c=4)   # small case
    _run_case(k2, n=8, h=16, w=16, c=4)   # batched case (TB > 1 path)

    print("KERNEL_OK")
</pallas_src>

<mosaic_0001>
module attributes {stable_mosaic.version = 11 : i64} {
  func.func @_conv3x3_kernel(%arg0: i32, %arg1: memref<1x16x16xf32, #tpu.memory_space<vmem>>, %arg2: memref<36xf32, #tpu.memory_space<smem>>, %arg3: memref<4xf32, #tpu.memory_space<smem>>, %arg4: memref<1x4x16x16xf32, #tpu.memory_space<vmem>>, %arg5: memref<1x18x18xf32, #tpu.memory_space<vmem>>) attributes {dimension_semantics = [#tpu.dimension_semantics<parallel>], iteration_bounds = array<i64: 2>, scalar_prefetch = 0 : i64, scratch_operands = 1 : i64, tpu.core_type = #tpu.core_type<tc>, window_params = [{transform_indices = @transform_0, window_bounds = array<i64: 1, 16, 16>}, {transform_indices = @transform_1, window_bounds = array<i64: 36>}, {transform_indices = @transform_2, window_bounds = array<i64: 4>}, {transform_indices = @transform_3, window_bounds = array<i64: 1, 4, 16, 16>}]} {
    %cst = arith.constant 0.000000e+00 : f32
    %0 = vector.broadcast %cst : f32 to vector<1x18x18xf32>
    %c0 = arith.constant 0 : index
    %c0_0 = arith.constant 0 : index
    %c0_1 = arith.constant 0 : index
    %1 = vector.load %arg5[%c0, %c0_0, %c0_1] : memref<1x18x18xf32, #tpu.memory_space<vmem>>, vector<1x18x18xf32>
    tpu.vector_store %arg5[%c0, %c0_0, %c0_1], %0 {strides = array<i32>} : memref<1x18x18xf32, #tpu.memory_space<vmem>>, vector<1x18x18xf32>,
    %c0_2 = arith.constant 0 : index
    %c0_3 = arith.constant 0 : index
    %c0_4 = arith.constant 0 : index
    %2 = vector.load %arg1[%c0_2, %c0_3, %c0_4] : memref<1x16x16xf32, #tpu.memory_space<vmem>>, vector<1x16x16xf32>
    %3 = tpu.transpose %2, [0, 2, 1] : vector<1x16x16xf32> -> vector<1x16x16xf32>
    %c0_5 = arith.constant 0 : index
    %c1 = arith.constant 1 : index
    %c1_6 = arith.constant 1 : index
    %4 = vector.load %arg5[%c0_5, %c1, %c1_6] : memref<1x18x18xf32, #tpu.memory_space<vmem>>, vector<1x16x16xf32>
    tpu.vector_store %arg5[%c0_5, %c1, %c1_6], %3 {strides = array<i32>} : memref<1x18x18xf32, #tpu.memory_space<vmem>>, vector<1x16x16xf32>,
    %c0_7 = arith.constant 0 : index
    %c0_8 = arith.constant 0 : index
    %c0_9 = arith.constant 0 : index
    %5 = vector.load %arg5[%c0_7, %c0_8, %c0_9] : memref<1x18x18xf32, #tpu.memory_space<vmem>>, vector<1x18x18xf32>
    %6 = vector.extract_strided_slice %5 {offsets = [0, 0, 0], sizes = [1, 16, 16], strides = [1, 1, 1]} : vector<1x18x18xf32> to vector<1x16x16xf32>
    %7 = vector.extract_strided_slice %5 {offsets = [0, 0, 1], sizes = [1, 16, 16], strides = [1, 1, 1]} : vector<1x18x18xf32> to vector<1x16x16xf32>
    %8 = vector.extract_strided_slice %5 {offsets = [0, 0, 2], sizes = [1, 16, 16], strides = [1, 1, 1]} : vector<1x18x18xf32> to vector<1x16x16xf32>
    %9 = vector.extract_strided_slice %5 {offsets = [0, 1, 0], sizes = [1, 16, 16], strides = [1, 1, 1]} : vector<1x18x18xf32> to vector<1x16x16xf32>
    %10 = vector.extract_strided_slice %5 {offsets = [0, 1, 1], sizes = [1, 16, 16], strides = [1, 1, 1]} : vector<1x18x18xf32> to vector<1x16x16xf32>
    %11 = vector.extract_strided_slice %5 {offsets = [0, 1, 2], sizes = [1, 16, 16], strides = [1, 1, 1]} : vector<1x18x18xf32> to vector<1x16x16xf32>
    %12 = vector.extract_strided_slice %5 {offsets = [0, 2, 0], sizes = [1, 16, 16], strides = [1, 1, 1]} : vector<1x18x18xf32> to vector<1x16x16xf32>
    %13 = vector.extract_strided_slice %5 {offsets = [0, 2, 1], sizes = [1, 16, 16], strides = [1, 1, 1]} : vector<1x18x18xf32> to vector<1x16x16xf32>
    %14 = vector.extract_strided_slice %5 {offsets = [0, 2, 2], sizes = [1, 16, 16], strides = [1, 1, 1]} : vector<1x18x18xf32> to vector<1x16x16xf32>
    %c0_10 = arith.constant 0 : index
    %15 = memref.load %arg2[%c0_10] : memref<36xf32, #tpu.memory_space<smem>>
    %c1_11 = arith.constant 1 : index
    %16 = memref.load %arg2[%c1_11] : memref<36xf32, #tpu.memory_space<smem>>
    %c2 = arith.constant 2 : index
    %17 = memref.load %arg2[%c2] : memref<36xf32, #tpu.memory_space<smem>>
    %c3 = arith.constant 3 : index
    %18 = memref.load %arg2[%c3] : memref<36xf32, #tpu.memory_space<smem>>
    %c4 = arith.constant 4 : index
    %19 = memref.load %arg2[%c4] : memref<36xf32, #tpu.memory_space<smem>>
    %c5 = arith.constant 5 : index
    %20 = memref.load %arg2[%c5] : memref<36xf32, #tpu.memory_space<smem>>
    %c6 = arith.constant 6 : index
    %21 = memref.load %arg2[%c6] : memref<36xf32, #tpu.memory_space<smem>>
    %c7 = arith.constant 7 : index
    %22 = memref.load %arg2[%c7] : memref<36xf32, #tpu.memory_space<smem>>
    %c8 = arith.constant 8 : index
    %23 = memref.load %arg2[%c8] : memref<36xf32, #tpu.memory_space<smem>>
    %c9 = arith.constant 9 : index
    %24 = memref.load %arg2[%c9] : memref<36xf32, #tpu.memory_space<smem>>
    %c10 = arith.constant 10 : index
    %25 = memref.load %arg2[%c10] : memref<36xf32, #tpu.memory_space<smem>>
    %c11 = arith.constant 11 : index
    %26 = memref.load %arg2[%c11] : memref<36xf32, #tpu.memory_space<smem>>
    %c12 = arith.constant 12 : index
    %27 = memref.load %arg2[%c12] : memref<36xf32, #tpu.memory_space<smem>>
    %c13 = arith.constant 13 : index
    %28 = memref.load %arg2[%c13] : memref<36xf32, #tpu.memory_space<smem>>
    %c14 = arith.constant 14 : index
    %29 = memref.load %arg2[%c14] : memref<36xf32, #tpu.memory_space<smem>>
    %c15 = arith.constant 15 : index
    %30 = memref.load %arg2[%c15] : memref<36xf32, #tpu.memory_space<smem>>
    %c16 = arith.constant 16 : index
    %31 = memref.load %arg2[%c16] : memref<36xf32, #tpu.memory_space<smem>>
    %c17 = arith.constant 17 : index
    %32 = memref.load %arg2[%c17] : memref<36xf32, #tpu.memory_space<smem>>
    %c18 = arith.constant 18 : index
    %33 = memref.load %arg2[%c18] : memref<36xf32, #tpu.memory_space<smem>>
    %c19 = arith.constant 19 : index
    %34 = memref.load %arg2[%c19] : memref<36xf32, #tpu.memory_space<smem>>
    %c20 = arith.constant 20 : index
    %35 = memref.load %arg2[%c20] : memref<36xf32, #tpu.memory_space<smem>>
    %c21 = arith.constant 21 : index
    %36 = memref.load %arg2[%c21] : memref<36xf32, #tpu.memory_space<smem>>
    %c22 = arith.constant 22 : index
    %37 = memref.load %arg2[%c22] : memref<36xf32, #tpu.memory_space<smem>>
    %c23 = arith.constant 23 : index
    %38 = memref.load %arg2[%c23] : memref<36xf32, #tpu.memory_space<smem>>
    %c24 = arith.constant 24 : index
    %39 = memref.load %arg2[%c24] : memref<36xf32, #tpu.memory_space<smem>>
    %c25 = arith.constant 25 : index
    %40 = memref.load %arg2[%c25] : memref<36xf32, #tpu.memory_space<smem>>
    %c26 = arith.constant 26 : index
    %41 = memref.load %arg2[%c26] : memref<36xf32, #tpu.memory_space<smem>>
    %c27 = arith.constant 27 : index
    %42 = memref.load %arg2[%c27] : memref<36xf32, #tpu.memory_space<smem>>
    %c28 = arith.constant 28 : index
    %43 = memref.load %arg2[%c28] : memref<36xf32, #tpu.memory_space<smem>>
    %c29 = arith.constant 29 : index
    %44 = memref.load %arg2[%c29] : memref<36xf32, #tpu.memory_space<smem>>
    %c30 = arith.constant 30 : index
    %45 = memref.load %arg2[%c30] : memref<36xf32, #tpu.memory_space<smem>>
    %c31 = arith.constant 31 : index
    %46 = memref.load %arg2[%c31] : memref<36xf32, #tpu.memory_space<smem>>
    %c32 = arith.constant 32 : index
    %47 = memref.load %arg2[%c32] : memref<36xf32, #tpu.memory_space<smem>>
    %c33 = arith.constant 33 : index
    %48 = memref.load %arg2[%c33] : memref<36xf32, #tpu.memory_space<smem>>
    %c34 = arith.constant 34 : index
    %49 = memref.load %arg2[%c34] : memref<36xf32, #tpu.memory_space<smem>>
    %c35 = arith.constant 35 : index
    %50 = memref.load %arg2[%c35] : memref<36xf32, #tpu.memory_space<smem>>
    %c0_12 = arith.constant 0 : index
    %51 = memref.load %arg3[%c0_12] : memref<4xf32, #tpu.memory_space<smem>>
    %c1_13 = arith.constant 1 : index
    %52 = memref.load %arg3[%c1_13] : memref<4xf32, #tpu.memory_space<smem>>
    %c2_14 = arith.constant 2 : index
    %53 = memref.load %arg3[%c2_14] : memref<4xf32, #tpu.memory_space<smem>>
    %c3_15 = arith.constant 3 : index
    %54 = memref.load %arg3[%c3_15] : memref<4xf32, #tpu.memory_space<smem>>
    %55 = vector.broadcast %15 : f32 to vector<1x16x16xf32>
    %56 = arith.mulf %6, %55 : vector<1x16x16xf32>
    %57 = vector.broadcast %16 : f32 to vector<1x16x16xf32>
    %58 = arith.mulf %7, %57 : vector<1x16x16xf32>
    %59 = arith.addf %56, %58 : vector<1x16x16xf32>
    %60 = vector.broadcast %17 : f32 to vector<1x16x16xf32>
    %61 = arith.mulf %8, %60 : vector<1x16x16xf32>
    %62 = arith.addf %59, %61 : vector<1x16x16xf32>
    %63 = vector.broadcast %18 : f32 to vector<1x16x16xf32>
    %64 = arith.mulf %9, %63 : vector<1x16x16xf32>
    %65 = arith.addf %62, %64 : vector<1x16x16xf32>
    %66 = vector.broadcast %19 : f32 to vector<1x16x16xf32>
    %67 = arith.mulf %10, %66 : vector<1x16x16xf32>
    %68 = arith.addf %65, %67 : vector<1x16x16xf32>
    %69 = vector.broadcast %20 : f32 to vector<1x16x16xf32>
    %70 = arith.mulf %11, %69 : vector<1x16x16xf32>
    %71 = arith.addf %68, %70 : vector<1x16x16xf32>
    %72 = vector.broadcast %21 : f32 to vector<1x16x16xf32>
    %73 = arith.mulf %12, %72 : vector<1x16x16xf32>
    %74 = arith.addf %71, %73 : vector<1x16x16xf32>
    %75 = vector.broadcast %22 : f32 to vector<1x16x16xf32>
    %76 = arith.mulf %13, %75 : vector<1x16x16xf32>
    %77 = arith.addf %74, %76 : vector<1x16x16xf32>
    %78 = vector.broadcast %23 : f32 to vector<1x16x16xf32>
    %79 = arith.mulf %14, %78 : vector<1x16x16xf32>
    %80 = arith.addf %77, %79 : vector<1x16x16xf32>
    %81 = vector.broadcast %51 : f32 to vector<1x16x16xf32>
    %82 = arith.addf %80, %81 : vector<1x16x16xf32>
    %c0_16 = arith.constant 0 : index
    %c0_17 = arith.constant 0 : index
    %c0_18 = arith.constant 0 : index
    %c0_19 = arith.constant 0 : index
    %83 = vector.load %arg4[%c0_16, %c0_17, %c0_18, %c0_19] : memref<1x4x16x16xf32, #tpu.memory_space<vmem>>, vector<1x1x16x16xf32>
    %84 = vector.shape_cast %83 : vector<1x1x16x16xf32> to vector<1x16x16xf32>
    %85 = vector.shape_cast %82 : vector<1x16x16xf32> to vector<1x1x16x16xf32>
    tpu.vector_store %arg4[%c0_16, %c0_17, %c0_18, %c0_19], %85 {strides = array<i32>} : memref<1x4x16x16xf32, #tpu.memory_space<vmem>>, vector<1x1x16x16xf32>,
    %86 = vector.broadcast %24 : f32 to vector<1x16x16xf32>
    %87 = arith.mulf %6, %86 : vector<1x16x16xf32>
    %88 = vector.broadcast %25 : f32 to vector<1x16x16xf32>
    %89 = arith.mulf %7, %88 : vector<1x16x16xf32>
    %90 = arith.addf %87, %89 : vector<1x16x16xf32>
    %91 = vector.broadcast %26 : f32 to vector<1x16x16xf32>
    %92 = arith.mulf %8, %91 : vector<1x16x16xf32>
    %93 = arith.addf %90, %92 : vector<1x16x16xf32>
    %94 = vector.broadcast %27 : f32 to vector<1x16x16xf32>
    %95 = arith.mulf %9, %94 : vector<1x16x16xf32>
    %96 = arith.addf %93, %95 : vector<1x16x16xf32>
    %97 = vector.broadcast %28 : f32 to vector<1x16x16xf32>
    %98 = arith.mulf %10, %97 : vector<1x16x16xf32>
    %99 = arith.addf %96, %98 : vector<1x16x16xf32>
    %100 = vector.broadcast %29 : f32 to vector<1x16x16xf32>
    %101 = arith.mulf %11, %100 : vector<1x16x16xf32>
    %102 = arith.addf %99, %101 : vector<1x16x16xf32>
    %103 = vector.broadcast %30 : f32 to vector<1x16x16xf32>
    %104 = arith.mulf %12, %103 : vector<1x16x16xf32>
    %105 = arith.addf %102, %104 : vector<1x16x16xf32>
    %106 = vector.broadcast %31 : f32 to vector<1x16x16xf32>
    %107 = arith.mulf %13, %106 : vector<1x16x16xf32>
    %108 = arith.addf %105, %107 : vector<1x16x16xf32>
    %109 = vector.broadcast %32 : f32 to vector<1x16x16xf32>
    %110 = arith.mulf %14, %109 : vector<1x16x16xf32>
    %111 = arith.addf %108, %110 : vector<1x16x16xf32>
    %112 = vector.broadcast %52 : f32 to vector<1x16x16xf32>
    %113 = arith.addf %111, %112 : vector<1x16x16xf32>
    %c0_20 = arith.constant 0 : index
    %c1_21 = arith.constant 1 : index
    %c0_22 = arith.constant 0 : index
    %c0_23 = arith.constant 0 : index
    %114 = vector.load %arg4[%c0_20, %c1_21, %c0_22, %c0_23] : memref<1x4x16x16xf32, #tpu.memory_space<vmem>>, vector<1x1x16x16xf32>
    %115 = vector.shape_cast %114 : vector<1x1x16x16xf32> to vector<1x16x16xf32>
    %116 = vector.shape_cast %113 : vector<1x16x16xf32> to vector<1x1x16x16xf32>
    tpu.vector_store %arg4[%c0_20, %c1_21, %c0_22, %c0_23], %116 {strides = array<i32>} : memref<1x4x16x16xf32, #tpu.memory_space<vmem>>, vector<1x1x16x16xf32>,
    %117 = vector.broadcast %33 : f32 to vector<1x16x16xf32>
    %118 = arith.mulf %6, %117 : vector<1x16x16xf32>
    %119 = vector.broadcast %34 : f32 to vector<1x16x16xf32>
    %120 = arith.mulf %7, %119 : vector<1x16x16xf32>
    %121 = arith.addf %118, %120 : vector<1x16x16xf32>
    %122 = vector.broadcast %35 : f32 to vector<1x16x16xf32>
    %123 = arith.mulf %8, %122 : vector<1x16x16xf32>
    %124 = arith.addf %121, %123 : vector<1x16x16xf32>
    %125 = vector.broadcast %36 : f32 to vector<1x16x16xf32>
    %126 = arith.mulf %9, %125 : vector<1x16x16xf32>
    %127 = arith.addf %124, %126 : vector<1x16x16xf32>
    %128 = vector.broadcast %37 : f32 to vector<1x16x16xf32>
    %129 = arith.mulf %10, %128 : vector<1x16x16xf32>
    %130 = arith.addf %127, %129 : vector<1x16x16xf32>
    %131 = vector.broadcast %38 : f32 to vector<1x16x16xf32>
    %132 = arith.mulf %11, %131 : vector<1x16x16xf32>
    %133 = arith.addf %130, %132 : vector<1x16x16xf32>
    %134 = vector.broadcast %39 : f32 to vector<1x16x16xf32>
    %135 = arith.mulf %12, %134 : vector<1x16x16xf32>
    %136 = arith.addf %133, %135 : vector<1x16x16xf32>
    %137 = vector.broadcast %40 : f32 to vector<1x16x16xf32>
    %138 = arith.mulf %13, %137 : vector<1x16x16xf32>
    %139 = arith.addf %136, %138 : vector<1x16x16xf32>
    %140 = vector.broadcast %41 : f32 to vector<1x16x16xf32>
    %141 = arith.mulf %14, %140 : vector<1x16x16xf32>
    %142 = arith.addf %139, %141 : vector<1x16x16xf32>
    %143 = vector.broadcast %53 : f32 to vector<1x16x16xf32>
    %144 = arith.addf %142, %143 : vector<1x16x16xf32>
    %c0_24 = arith.constant 0 : index
    %c2_25 = arith.constant 2 : index
    %c0_26 = arith.constant 0 : index
    %c0_27 = arith.constant 0 : index
    %145 = vector.load %arg4[%c0_24, %c2_25, %c0_26, %c0_27] : memref<1x4x16x16xf32, #tpu.memory_space<vmem>>, vector<1x1x16x16xf32>
    %146 = vector.shape_cast %145 : vector<1x1x16x16xf32> to vector<1x16x16xf32>
    %147 = vector.shape_cast %144 : vector<1x16x16xf32> to vector<1x1x16x16xf32>
    tpu.vector_store %arg4[%c0_24, %c2_25, %c0_26, %c0_27], %147 {strides = array<i32>} : memref<1x4x16x16xf32, #tpu.memory_space<vmem>>, vector<1x1x16x16xf32>,
    %148 = vector.broadcast %42 : f32 to vector<1x16x16xf32>
    %149 = arith.mulf %6, %148 : vector<1x16x16xf32>
    %150 = vector.broadcast %43 : f32 to vector<1x16x16xf32>
    %151 = arith.mulf %7, %150 : vector<1x16x16xf32>
    %152 = arith.addf %149, %151 : vector<1x16x16xf32>
    %153 = vector.broadcast %44 : f32 to vector<1x16x16xf32>
    %154 = arith.mulf %8, %153 : vector<1x16x16xf32>
    %155 = arith.addf %152, %154 : vector<1x16x16xf32>
    %156 = vector.broadcast %45 : f32 to vector<1x16x16xf32>
    %157 = arith.mulf %9, %156 : vector<1x16x16xf32>
    %158 = arith.addf %155, %157 : vector<1x16x16xf32>
    %159 = vector.broadcast %46 : f32 to vector<1x16x16xf32>
    %160 = arith.mulf %10, %159 : vector<1x16x16xf32>
    %161 = arith.addf %158, %160 : vector<1x16x16xf32>
    %162 = vector.broadcast %47 : f32 to vector<1x16x16xf32>
    %163 = arith.mulf %11, %162 : vector<1x16x16xf32>
    %164 = arith.addf %161, %163 : vector<1x16x16xf32>
    %165 = vector.broadcast %48 : f32 to vector<1x16x16xf32>
    %166 = arith.mulf %12, %165 : vector<1x16x16xf32>
    %167 = arith.addf %164, %166 : vector<1x16x16xf32>
    %168 = vector.broadcast %49 : f32 to vector<1x16x16xf32>
    %169 = arith.mulf %13, %168 : vector<1x16x16xf32>
    %170 = arith.addf %167, %169 : vector<1x16x16xf32>
    %171 = vector.broadcast %50 : f32 to vector<1x16x16xf32>
    %172 = arith.mulf %14, %171 : vector<1x16x16xf32>
    %173 = arith.addf %170, %172 : vector<1x16x16xf32>
    %174 = vector.broadcast %54 : f32 to vector<1x16x16xf32>
    %175 = arith.addf %173, %174 : vector<1x16x16xf32>
    %c0_28 = arith.constant 0 : index
    %c3_29 = arith.constant 3 : index
    %c0_30 = arith.constant 0 : index
    %c0_31 = arith.constant 0 : index
    %176 = vector.load %arg4[%c0_28, %c3_29, %c0_30, %c0_31] : memref<1x4x16x16xf32, #tpu.memory_space<vmem>>, vector<1x1x16x16xf32>
    %177 = vector.shape_cast %176 : vector<1x1x16x16xf32> to vector<1x16x16xf32>
    %178 = vector.shape_cast %175 : vector<1x16x16xf32> to vector<1x1x16x16xf32>
    tpu.vector_store %arg4[%c0_28, %c3_29, %c0_30, %c0_31], %178 {strides = array<i32>} : memref<1x4x16x16xf32, #tpu.memory_space<vmem>>, vector<1x1x16x16xf32>,
    return
  }
  func.func @transform_0(%arg0: i32) -> (i32, i32, i32) {
    %c0_i32 = arith.constant 0 : i32
    %c0_i32_0 = arith.constant 0 : i32
    %c0_i32_1 = arith.constant 0 : i32
    return %arg0, %c0_i32, %c0_i32_0 : i32, i32, i32
  }
  func.func @transform_1(%arg0: i32) -> i32 {
    %c0_i32 = arith.constant 0 : i32
    %c0_i32_0 = arith.constant 0 : i32
    return %c0_i32 : i32
  }
  func.func @transform_2(%arg0: i32) -> i32 {
    %c0_i32 = arith.constant 0 : i32
    %c0_i32_0 = arith.constant 0 : i32
    return %c0_i32 : i32
  }
  func.func @transform_3(%arg0: i32) -> (i32, i32, i32, i32) {
    %c0_i32 = arith.constant 0 : i32
    %c0_i32_0 = arith.constant 0 : i32
    %c0_i32_1 = arith.constant 0 : i32
    %c0_i32_2 = arith.constant 0 : i32
    return %arg0, %c0_i32, %c0_i32_0, %c0_i32_1 : i32, i32, i32, i32
  }
}

</mosaic_0001>

<bundles_post_ra>
// kernel: tpu_custom_call.1
= control target key start
LH: loop header
LB: loop body
LE: loop exit
PB: predicated region body
PF: predicated region fallthrough
CT: control target
= control target key end

     0   :  { %s2148_s0 = inlined_call_operand.hbm [shape: f32[2,16,16], index: 0, kind: input, shape index: {}]   ;;  %s2149_s1 = inlined_call_operand.vmem [shape: f32[36], index: 1, kind: input, shape index: {}]   ;;  %s2150_s2 = inlined_call_operand.vmem [shape: f32[4], index: 2, kind: input, shape index: {}]   ;;  %s2151_s3 = inlined_call_operand.hbm [shape: f32[2,4,16,16], index: 3, kind: output, shape index: {}]  }
   0x1   :  { %2178 = sst [smem:[#allocation23_spill]] %s2148_s0 }
   0x2   :  { %2179 = sst [smem:[#allocation24_spill]] %s2149_s1 }
   0x3   :  { %2180 = sst [smem:[#allocation25_spill]] %s2150_s2 }
   0x4   :  { %2181 = sst [smem:[#allocation26_spill]] %s2151_s3 }
   0x5   :  { %8 = vsyncpa [#allocation4], 0 }
   0x6   :  { %10 = vsyncpa [#allocation4 + $0x1], 0 }
   0x7   :  { %11 = vsyncpa [#allocation6], 0 }
   0x8   :  { %12 = vsyncpa [#allocation9], 0 }
   0x9   :  { %13 = vsyncpa [#allocation5], 0 }
   0xa   :  { %15 = vsyncpa [#allocation5 + $0x1], 0  ;;  %s1315_s12 = smov 0   ;;  %s1317_s13 = smov 0  }
   0xb   :  { %s1319_s14 = smov 0   ;;  %s1321_s15 = smov 0  }
   0xc LB: > { %2182 = sst [smem:[#allocation15_spill]] %s1269_s12  ;;  %s1336_s16 = sadd.s32 4294967295, %s1281_s15   ;;  %s1281_s15 = sphi %s1321_s15, %s2228_s15   ;;  %s1277_s14 = sphi %s1319_s14, %s2231_s14   ;;  %s1273_s13 = sphi %s1317_s13, %s2230_s13   ;;  %s1269_s12 = sphi %s1315_s12, %s2229_s12  }
   0xd   : > { %2183 = sst [smem:[#allocation16_spill]] %s1273_s13  ;;  %s1008_s17 = sadd.s32 4294967294, %s1281_s15  }
   0xe   : > { %2184 = sst [smem:[#allocation17_spill]] %s1277_s14  ;;  %s1340_s18 = sadd.s32 1, %s1281_s15  }
   0xf   : > { %2185 = sst [smem:[#allocation18_spill]] %s1281_s15  ;;  %s28_s19 = sadd.s32 1, %s1277_s14 }
  0x10   : > { %2186 = sst [smem:[#allocation19_spill]] %s1340_s18  ;;  %s25_s20 = ssub.s32 %s1281_s15, %s1340_s18 }
  0x11   : > { %p35_p0 = scmp.ne.s32.totalorder %s1277_s14, %s1273_s13  ;;  %p26_p1 = scmp.eq.s32.totalorder %s25_s20, 0 }
  0x12   : > { %p36_p2 = scmp.eq.s32.totalorder %s1281_s15, 0  ;;  %p41_p3 = scmp.ne.s32.totalorder %s1273_s13, %s1269_s12 }
  0x13   : > { %p2152_p4 = scmp.eq.s32.totalorder %s1336_s16, 0  ;;  %p107_p7 = scmp.eq.s32.totalorder %s1336_s16, 1 }
  0x14   : > { %s1352_s21 = scalar_select %p26_p1, %s1277_s14, %s28_s19  }
  0x15   : > { %p1354_p5 = por %p36_p2, %p35_p0  ;;  %p1360_p6 = por %p2152_p4, %p41_p3 }
  0x16   : > { %2187 = sst [smem:[#allocation20_spill]] %s1352_s21  ;;  %p113_p8 = scmp.eq.s32.totalorder %s1008_s17, 1 }
  0x17   : > { %s2189_s23 = scalar_select %p1360_p6, 1, 0 }
  0x18   : > { %p1009_p9 = scmp.ge.s32.totalorder %s1281_s15, 1  ;;  %p120_p10 = scmp.lt.s32.totalorder %s1281_s15, 3 }
  0x19   : > { %p1367_p11 = por %p107_p7, %p35_p0  ;;  %p1371_p12 = por %p113_p8, %p41_p3 }
  0x1a   : > { %p1375_p13 = pnand %p1009_p9, %p120_p10  ;;  %s2194_s1 = sld [smem:[#allocation24_spill]] }
  0x1b   : > { %s2190_s24 = scalar_select %p1367_p11, 1, 0 }
  0x1c   : > { %s2191_s25 = scalar_select %p1371_p12, 1, 0 }
  0x1d   : > { %s2193_s26 = scalar_select %p1375_p13, 1, 0 }
  0x1e   : > { %2192 = sst [smem:[#allocation21_spill]] %s2191_s25  ;;  %p1084_p1 = pneg %p1375_p13 }
  0x1f   : > { %p1101_p2 = scmp.lt.s32.totalorder %s1281_s15, 2  ;;  %s2196_s2 = sld [smem:[#allocation25_spill]] }
  0x20   : > { %s133_s29 = sshll.u32 %s2194_s1, 4  ;;  %p1388_p7 = pnand %p1084_p1, %p2152_p4  ;;  %s134_s29 = int_to_ptr.vmem [resolvable:$true] %s133_s29 }
  0x21   : > { %p1397_p3 = pnand %p1101_p2, %p1354_p5  ;;  %s1147_s8 = scalar_lea.vmem %s134_s29, 16 }
  0x22   : > { %p1148_p8 = scmp.ne.s32.totalorder %s134_s29, %s1147_s8  ;;  %p1149_p9 = pneg %p1388_p7 }
  0x23   : > { %s2197_s7 = scalar_select %p1397_p3, 1, 0 }
  0x24   : > { %p1150_p10 = pnand %p1149_p9, %p1148_p8  ;;  %p1155_p0 = scmp.lt.s32.totalorder %s134_s29, %s134_s29 }
  0x25   : > { %s144_s6 = sshll.u32 %s2196_s2, 4  ;;  %p1156_p4 = scmp.lt.s32.totalorder %s1147_s8, %s1147_s8  ;;  %s145_s6 = int_to_ptr.vmem [resolvable:$true] %s144_s6 }
  0x26   : > { %p1151_p1 = pneg %p1150_p10 }
  0x27   : > { %p1157_p12 = por %p1156_p4, %p1155_p0 }
  0x29   : > { %p1158_p11 = pnand %p1157_p12, %p1151_p1 }
  0x2b   : > { %1161 = shalt.err (!%p1158_p11)
}
  0x2c   : > { %s1283_s9 = smov [#allocation7]   ;;  %s155_s10 = sand.u32 1, %s1277_s14  }
  0x2d   : > { %1087 = dma.vmem_to_smem (!%p1388_p7), %s134_s29, 16, %s1283_s9, [#allocation6]  }
  0x2e   : > { %s1162_s11 = scalar_lea.vmem %s145_s6, 16  ;;  %p1170_p8 = scmp.lt.s32.totalorder %s145_s6, %s145_s6 }
  0x2f   : > { %p1163_p5 = scmp.ne.s32.totalorder %s145_s6, %s1162_s11  ;;  %p1171_p10 = scmp.lt.s32.totalorder %s1162_s11, %s1162_s11 }
  0x31   : > { %p1165_p2 = pnand %p1163_p5, %p1149_p9  ;;  %p1172_p13 = por %p1171_p10, %p1170_p8 }
  0x33   : > { %p1166_p6 = pneg %p1165_p2 }
  0x35   : > { %p1173_p3 = pnand %p1172_p13, %p1166_p6 }
  0x37   : > { %1176 = shalt.err (!%p1173_p3)
}
  0x38   : > { %s1284_s17 = smov [#allocation8]   ;;  %s1013_s19 = sshll.u32 %s155_s10, 4 }
  0x39   : > { %1090 = dma.vmem_to_smem (!%p1388_p7), %s145_s6, 16, %s1284_s17, [#allocation9]  }
  0x3a   : > { %s1070_s20 = sshll.u32 %s1281_s15, 8  ;;  %s2198_s0 = sld [smem:[#allocation23_spill]] }
  0x3b   : > { %s159_s29 = scalar_lea.vmem [#allocation3], %s1013_s19  ;;  %s1422_s30 = scalar_lea.sflag [#allocation4], %s155_s10 }
  0x3c   : > { %s166_s4 = sshll.u32 %s159_s29, 4  ;;  %p2199_p6 = scmp.ne.s32.totalorder %s2197_s7, 0  ;;  %s1420_s4 = int_to_ptr.vmem [resolvable:$true] %s166_s4 }
  0x3e   : > { %p1179_p11 = pneg %p2199_p6 }
  0x40   : > { %s1418_s28 = scalar_lea.hbm %s2198_s0, %s1070_s20  ;;  %s1182_s9 = scalar_lea.hbm %s2198_s0, 512 }
  0x41   : > { %s1177_s5 = scalar_lea.hbm %s1418_s28, 256  ;;  %p1183_p0 = scmp.lt.u32.totalorder %s1418_s28, %s2198_s0 }
  0x42   : > { %p1178_p4 = scmp.ne.s32.totalorder %s1418_s28, %s1177_s5  ;;  %p1184_p7 = scmp.lt.u32.totalorder %s1182_s9, %s1177_s5 }
  0x43   : > { %p1186_p9 = scmp.lt.u32.totalorder %s1177_s5, %s1418_s28 }
  0x44   : > { %p1180_p12 = pnand %p1179_p11, %p1178_p4  ;;  %p1185_p3 = por %p1184_p7, %p1183_p0 }
  0x46   : > { %p1181_p13 = pneg %p1180_p12  ;;  %p1187_p1 = por %p1186_p9, %p1185_p3 }
  0x48   : > { %p1188_p5 = pnand %p1187_p1, %p1181_p13 }
  0x4a   : > { %1191 = shalt.err (!%p1188_p5)
}
  0x4b   : > { %s1192_s10 = scalar_lea.vmem %s1420_s4, 256  ;;  %s1285_s19 = smov [#allocation3]  }
  0x4c   : > { %p1193_p2 = scmp.ne.s32.totalorder %s1420_s4, %s1192_s10  ;;  %s1197_s20 = sshll.u32 %s1285_s19, 4  ;;  %s1198_s20 = int_to_ptr.vmem [resolvable:$false] %s1197_s20 }
  0x4d   : > { %s1199_s22 = scalar_lea.vmem %s1198_s20, 512  ;;  %p1200_p4 = scmp.lt.s32.totalorder %s1420_s4, %s1198_s20 }
  0x4e   : > { %p1195_p8 = pnand %p1193_p2, %p1179_p11  ;;  %p1201_p12 = scmp.lt.s32.totalorder %s1199_s22, %s1192_s10 }
  0x50   : > { %p1196_p10 = pneg %p1195_p8  ;;  %p1202_p0 = por %p1201_p12, %p1200_p4 }
  0x52   : > { %p1203_p7 = pnand %p1202_p0, %p1196_p10 }
  0x54   : > { %1206 = shalt.err (!%p1203_p7)
}
  0x55   : > { %s1286_s27 = smov 128   ;;  %s1287_s29 = smov 8  }
  0x56   : > { %1094 = dma.hbm_to_vmem [thread:$0]  (!%p2199_p6), %s1418_s28, 256, %s1420_s4, %s1422_s30, %s1286_s27, %s1286_s27, %s1287_s29  }
  0x57   : > { %p2200_p11 = scmp.ne.s32.totalorder %s2193_s26, 0 }
  0x59   : > { %178 = sbr.rel (%p2200_p11) target bundleno = 610 (0x262), region = 32 }
  0x60   : > { %s1453_s5 = sand.u32 1, %s1273_s13   ;;  %p2201_p13 = scmp.ne.s32.totalorder %s2189_s23, 0 }
  0x61   : > { %s1017_s6 = sshll.u32 %s1453_s5, 4  ;;  %s181_s8 = scalar_lea.sflag [#allocation4], %s1453_s5 }
  0x62   : > { %s184_s9 = scalar_lea.vmem [#allocation3], %s1017_s6 }
  0x63   : > { %1252 = dma.done.wait (%p2201_p13), %s181_s8, 256  }
  0x64   : > { %1254 = vsyncadd (%p2201_p13), %s181_s8, 4294967040  ;;  %p2202_p3 = scmp.eq.s32.totalorder %s1336_s16, 0 }
  0x66   : > { %1256 = dma.done.wait (%p2202_p3), [#allocation6], 16   ;;  %p2203_p6 = pmov %p2202_p3 }
  0x67   : > { %p2204_p9 = pmov %p2202_p3 }
  0x68   : > { %1258 = vsyncadd (%p2203_p6), [#allocation6], 4294967280 }
  0x69   : > { %1260 = dma.done.wait (%p2204_p9), [#allocation9], 16   ;;  %p2205_p1 = pmov %p2202_p3 }
  0x6b   : > { %1262 = vsyncadd (%p2205_p1), [#allocation9], 4294967280 }
  0x6c   : > { %197 = sfence }
  0x6d   : > { %v221_v0 = vld [vmem:[%s184_s9] sm:$0xff]  ;;  %v222_v1 = vld [vmem:[%s184_s9 + $0x8] sm:$0xff]  ;;  %vm216_vm0 = vcmask 146432   ;;  %v1288_v2 = vmov 0.0   ;;  %vm219_vm1 = vcmask 140288   ;;  %s1289_s23 = smov 1  }
  0x6e   : > { %223 = vxpose.xlu0.b32.start [1/2] (short) (narrow) %v221_v0, 16  ;;  %217 = vst.msk [vmem:[#allocation2] sm:$0xff] %vm216_vm0, %v1288_v2  ;;  %218 = vst.msk [vmem:[#allocation2 + $0x8] sm:$0xff] %vm216_vm0, %v1288_v2  ;;  %vm263_vm2 = vcmask 138248   ;;  %s1469_s26 = sld [smem:[#allocation7 + $0x2]]  ;;  %s1471_s7 = sld [smem:[#allocation7 + $0x1]] }
  0x6f   : > { %220 = vst.msk [vmem:[#allocation2 + $0x10] sm:$0x3] %vm219_vm1, %v1288_v2  ;;  %s1473_s28 = sld [smem:[#allocation7 + $0xa]]  ;;  %s1475_s4 = sld [smem:[#allocation7 + $0x13]]  ;;  %vm345_vm3 = vcmask 1046528   ;;  %vm402_vm4 = vcmask 1045504  }
  0x70   : > { %s1479_s30 = sld [smem:[#allocation7 + $0x1c]]  ;;  %s1487_s11 = sld [smem:[#allocation7 + $0xb]]  ;;  %vm455_vm5 = vcmask 130048  }
  0x71   : > { %s1489_s17 = sld [smem:[#allocation7 + $0x14]]  ;;  %s2157_s10 = smov 126  }
  0x72   : > { %224 = vxpose.xlu0.b32.end [2/2] (short) (narrow) %v222_v1, 16  ;;  %s2159_s19 = smov 127   ;;  %s1493_s20 = sld [smem:[#allocation7 + $0x1d]] }
  0x73   : > { %s1495_s22 = sld [smem:[#allocation7 + $0xd]]  ;;  %s1497_s27 = sld [smem:[#allocation7 + $0x16]] }
  0x74   : > { %v325_v7 = vstv %s1469_s26  ;;  %v312_v8 = vstv %s1471_s7  ;;  %s1499_s29 = sld [smem:[#allocation7 + $0x1f]]  ;;  %s1505_s6 = sld [smem:[#allocation7 + $0xe]] }
  0x75   : > { %v461_v12 = vstv %s1473_s28  ;;  %v608_v13 = vstv %s1475_s4  ;;  %s1507_s8 = sld [smem:[#allocation7 + $0x4]]  ;;  %s1512_s9 = sld [smem:[#allocation7 + $0x17]] }
  0x76   : > { %v755_v17 = vstv %s1479_s30  ;;  %s1518_s26 = sld [smem:[#allocation7 + $0x5]]  ;;  %s1520_s7 = sld [smem:[#allocation7 + $0x10]]  ;;  %v474_v20 = vstv %s1487_s11 }
  0x77   : > { %s1522_s28 = sld [smem:[#allocation7 + $0x19]]  ;;  %s1530_s0 = sld [smem:[#allocation7 + $0x22]]  ;;  %v621_v23 = vstv %s1489_s17 }
  0x78   : > { %s1535_s1 = sld [smem:[#allocation7 + $0x23]]  ;;  %s1537_s2 = sld [smem:[#allocation7 + $0xc]]  ;;  %v768_v24 = vstv %s1493_s20 }
  0x79   : > { %s2206_s21 = smov 127   ;;  %s1541_s14 = sld [smem:[#allocation7 + $0x15]]  ;;  %v1558_v25 = vstv %s1495_s22  ;;  %v1561_v26 = vstv %s1497_s27 }
  0x7a   : > { %s1543_s13 = sld [smem:[#allocation7 + $0x1e]]  ;;  %s1545_s18 = sld [smem:[#allocation7 + $0x3]]  ;;  %v1564_v27 = vstv %s1499_s29  ;;  %v1571_v28 = vstv %s1505_s6 }
  0x7b   : > { %s1547_s15 = sld [smem:[#allocation7 + $0xf]]  ;;  %s1554_s25 = sld [smem:[#allocation7 + $0x18]]  ;;  %v355_v29 = vstv %s1507_s8  ;;  %v1577_v30 = vstv %s1512_s9 }
  0x7c   : > { %s1566_s12 = sld [smem:[#allocation7 + $0x6]]  ;;  %s2207_s3 = smov 126   ;;  %v1583_v32 = vstv %s1518_s26  ;;  %v1586_v33 = vstv %s1520_s7 }
  0x7d   : > { %s1574_s17 = sld [smem:[#allocation7 + $0x21]]  ;;  %v1591_v36 = vstv %s1522_s28  ;;  %v1601_v39 = vstv %s1530_s0  ;;  %s1071_s30 = sshll.u32 %s1336_s16, 10 }
  0x7e   : > { %v1607_v41 = vstv %s1535_s1  ;;  %v1612_v42 = vstv %s1537_s2  ;;  %s1859_s0 = sld [smem:[#allocation7 + $0x11]]  ;;  %s1888_s1 = sld [smem:[#allocation7 + $0x1a]] }
  0x7f   : > { %v1615_v43 = vstv %s1541_s14  ;;  %s269_s2 = sld [smem:[#allocation7]]  ;;  %s1047_s14 = sld [smem:[#allocation7 + $0x1b]] }
  0x80   : > { %v1620_v45 = vstv %s1543_s13  ;;  %v1623_v46 = vstv %s1545_s18  ;;  %s1038_s13 = sld [smem:[#allocation7 + $0x12]]  ;;  %s1020_s18 = sshll.u32 %s1453_s5, 6 }
  0x81   : > { %v1626_v47 = vstv %s1547_s15  ;;  %v1639_v51 = vstv %s1554_s25  ;;  %s2062_s15 = sld [smem:[#allocation8 + $0x1]]  ;;  %s2069_s25 = sld [smem:[#allocation8 + $0x3]] }
  0x82   : > { %v1647_v55 = vstv %s1566_s12  ;;  %s1029_s12 = sld [smem:[#allocation7 + $0x9]]  ;;  %s2071_s4 = scalar_lea.vmem [#allocation10], %s1020_s18 }
  0x83   : > { %v1659_v59 = vstv %s1574_s17  ;;  %s913_s11 = sshll.u32 %s2071_s4, 4  ;;  %s2221_s20 = sld [smem:[#allocation26_spill]]  ;;  %s2102_s11 = int_to_ptr.vmem [resolvable:$true] %s913_s11 }
  0x84   : > { %s900_s27 = scalar_lea.sflag [#allocation5], %s1453_s5  ;;  %s1207_s16 = scalar_lea.vmem %s2102_s11, 1024 }
  0x85   : > { %p1208_p5 = scmp.ne.s32.totalorder %s2102_s11, %s1207_s16  ;;  %p2222_p2 = scmp.ne.s32.totalorder %s2190_s24, 0 }
  0x86   : > { %s1292_s29 = smov [#allocation10]  }
  0x87   : > { %p1209_p8 = pnand %p1208_p5, %p2222_p2  ;;  %s1211_s6 = sshll.u32 %s1292_s29, 4  ;;  %s1212_s6 = int_to_ptr.vmem [resolvable:$false] %s1211_s6 }
  0x88   : > { %s1213_s8 = scalar_lea.vmem %s1212_s6, 2048  ;;  %p1214_p4 = scmp.lt.s32.totalorder %s2102_s11, %s1212_s6 }
  0x89   : > { %s2100_s22 = scalar_lea.hbm %s2221_s20, %s1071_s30  ;;  %p1210_p10 = pneg %p1209_p8 }
  0x8a   : > { %p1215_p12 = scmp.lt.s32.totalorder %s1213_s8, %s1207_s16 }
  0x8c   : > { %p1216_p0 = por %p1215_p12, %p1214_p4 }
  0x8e   : > { %p1217_p7 = pnand %p1216_p0, %p1210_p10 }
  0xee   : > { %v239_v3 = vpop.trf.xlu0 }
  0xef   : > { %257 = vrot.lane.b32.xlu1 %v239_v3, %s1289_s23 }
  0xf2   : > { %v240_v4 = vpop.trf.xlu0 }
  0xf3   : > { %259 = vrot.lane.b32.xlu1 %v240_v4, %s1289_s23  ;;  %s1514_s23 = sld [smem:[#allocation7 + $0x20]] }
  0xf9   : > { %v1580_v31 = vstv %s1514_s23 }
 0x161   : > { %v258_v5 = vpop.permute.xlu1 %257 }
 0x162   : > { %264 = vst.msk [vmem:[#allocation2 + $0x1] sm:$0xff] %vm263_vm2, %v258_v5 }
 0x165   : > { %v260_v6 = vpop.permute.xlu1 %259 }
 0x166   : > { %265 = vst.msk [vmem:[#allocation2 + $0x9] sm:$0xff] %vm263_vm2, %v260_v6 }
 0x169   : > { %v1481_v9 = vld [vmem:[#allocation2] sm:$0xff] }
 0x16a   : > { %v326_v10 = vmul.f32 %v325_v7, %v1481_v9  ;;  %v313_v11 = vmul.f32 %v312_v8, %v1481_v9  ;;  %v462_v14 = vmul.f32 %v461_v12, %v1481_v9  ;;  %v609_v15 = vmul.f32 %v608_v13, %v1481_v9 }
 0x16b   : > { %v756_v19 = vmul.f32 %v755_v17, %v1481_v9  ;;  %v475_v22 = vmul.f32 %v474_v20, %v1481_v9  ;;  %v622_v35 = vmul.f32 %v621_v23, %v1481_v9  ;;  %v504_v44 = vmul.f32 %v1558_v25, %v1481_v9 }
 0x16c   : > { %330 = vrot.lane.b32.xlu1 %v326_v10, %s2157_s10  ;;  %317 = vrot.lane.b32.xlu0 %v313_v11, %s2159_s19  ;;  %s1524_s10 = sld [smem:[#allocation7 + $0x7]]  ;;  %v769_v49 = vmul.f32 %v768_v24, %v1481_v9  ;;  %v651_v53 = vmul.f32 %v1561_v26, %v1481_v9  ;;  %v798_v54 = vmul.f32 %v1564_v27, %v1481_v9 }
 0x16d   : > { %v1509_v16 = vld [vmem:[#allocation2 + $0x8] sm:$0xff]  ;;  %v524_v57 = vmul.f32 %v1571_v28, %v1481_v9  ;;  %v356_v58 = vmul.f32 %v355_v29, %v1481_v9  ;;  %v510_v60 = vrot.slane %v504_v44, 1  ;;  %v671_v62 = vmul.f32 %v1577_v30, %v1481_v9  ;;  %v1669_v0 = vld [vmem:[#allocation2 + $0x10] sm:$0x3] }
 0x16e   : > { %v314_v18 = vmul.f32 %v312_v8, %v1509_v16  ;;  %v327_v21 = vmul.f32 %v325_v7, %v1509_v16  ;;  %v463_v34 = vmul.f32 %v461_v12, %v1509_v16  ;;  %v1598_v38 = vmul.f32 %v1558_v25, %v1509_v16 }
 0x16f   : > { %v610_v48 = vmul.f32 %v608_v13, %v1509_v16  ;;  %v1636_v50 = vmul.f32 %v1561_v26, %v1509_v16  ;;  %v1653_v56 = vmul.f32 %v1564_v27, %v1509_v16  ;;  %v1663_v61 = vmul.f32 %v1571_v28, %v1509_v16 }
 0x170   : > { %466 = vrot.lane.b32.xlu1 %v462_v14, %s2159_s19  ;;  %613 = vrot.lane.b32.xlu0 %v609_v15, %s2159_s19  ;;  %s1532_s19 = sld [smem:[#allocation7 + $0x8]]  ;;  %v2177_v52 = vrot.slane %v1598_v38, 1  ;;  %v818_v63 = vmul.f32 %v1580_v31, %v1481_v9  ;;  %v757_v1 = vmul.f32 %v755_v17, %v1509_v16  ;;  %v476_v2 = vmul.f32 %v474_v20, %v1509_v16 }
 0x171   : > { %v2176_v3 = vrot.slane %v1636_v50, 1  ;;  %v357_v4 = vmul.f32 %v355_v29, %v1509_v16  ;;  %v657_v6 = vrot.slane %v651_v53, 1  ;;  %v623_v7 = vmul.f32 %v621_v23, %v1509_v16 }
 0x172   : > { %v1594_v37 = vstv %s1524_s10  ;;  %v512_v5 = vsel %vm345_vm3, %v510_v60, %v2177_v52  ;;  %v1685_v8 = vmul.f32 %v1577_v30, %v1509_v16  ;;  %v804_v10 = vrot.slane %v798_v54, 1 }
 0x173   : > { %v2175_v11 = vrot.slane %v1653_v56, 1  ;;  %v770_v12 = vmul.f32 %v768_v24, %v1509_v16  ;;  %v530_v13 = vrot.slane %v524_v57, 1  ;;  %v2173_v14 = vrot.slane %v1663_v61, 1 }
 0x174   : > { %319 = vrot.lane.b32.xlu1 %v314_v18, %s2206_s21  ;;  %760 = vrot.lane.b32.xlu0 %v756_v19, %s2206_s21  ;;  %v358_v15 = vmul.f32 %v355_v29, %v1669_v0  ;;  %v1697_v17 = vmul.f32 %v1580_v31, %v1509_v16  ;;  %v377_v18 = vmul.f32 %v1583_v32, %v1509_v16  ;;  %v362_v20 = vrot.slane %v356_v58, 1 }
 0x175   : > { %v659_v19 = vsel %vm345_vm3, %v657_v6, %v2176_v3  ;;  %v2172_v23 = vrot.slane %v1685_v8, 1  ;;  %v376_v24 = vmul.f32 %v1583_v32, %v1481_v9  ;;  %v378_v29 = vmul.f32 %v1583_v32, %v1669_v0 }
 0x176   : > { %v1604_v40 = vstv %s1532_s19  ;;  %v677_v44 = vrot.slane %v671_v62, 1  ;;  %v365_v32 = vrot.slane %v358_v15, 1  ;;  %v2171_v53 = vrot.slane %v1697_v17, 1 }
 0x177   : > { %v383_v54 = vrot.slane %v377_v18, 1  ;;  %v707_v57 = vmul.f32 %v1591_v36, %v1481_v9  ;;  %v532_v58 = vsel %vm345_vm3, %v530_v13, %v2173_v14  ;;  %v824_v62 = vrot.slane %v818_v63, 1 }
 0x178   : > { %332 = vrot.lane.b32.xlu1 %v327_v21, %s2207_s3  ;;  %479 = vrot.lane.b32.xlu0 %v475_v22, %s2207_s3  ;;  %v363_v21 = vrot.slane %v357_v4, 1  ;;  %v1706_v22 = vmul.f32 %v1586_v33, %v1509_v16  ;;  %v382_v4 = vrot.slane %v376_v24, 1  ;;  %v1744_v13 = vmul.f32 %v1594_v37, %v1509_v16 }
 0x179   : > { %v876_v15 = vmul.f32 %v1607_v41, %v1669_v0  ;;  %v838_v52 = vmul.f32 %v1659_v59, %v1481_v9 }
 0x17a   : > { %v364_v60 = vsel %vm345_vm3, %v362_v20, %v363_v21  ;;  %v366_v18 = vsel %vm345_vm3, %v363_v21, %v365_v32  ;;  %v713_v20 = vrot.slane %v707_v57, 2  ;;  %v1767_v21 = vmul.f32 %v1601_v39, %v1481_v9 }
 0x17b   : > { %v1779_v32 = vmul.f32 %v1601_v39, %v1509_v16  ;;  %v1783_v57 = vmul.f32 %v1594_v37, %v1669_v0 }
 0x17c   : > { %468 = vrot.lane.b32.xlu1 %v463_v34, %s2206_s21  ;;  %626 = vrot.lane.b32.xlu0 %v622_v35, %s2207_s3  ;;  %v1715_v34 = vmul.f32 %v1591_v36, %v1509_v16  ;;  %v806_v35 = vsel %vm345_vm3, %v804_v10, %v2175_v11  ;;  %v341_v11 = vmul.f32 %v1623_v46, %v1669_v0 }
 0x17e   : > { %v2169_v6 = vrot.slane %v1715_v34, 2 }
 0x180   : > { %615 = vrot.lane.b32.xlu1 %v610_v48, %s2206_s21  ;;  %773 = vrot.lane.b32.xlu0 %v769_v49, %s2207_s3  ;;  %v560_v48 = vmul.f32 %v1586_v33, %v1481_v9  ;;  %v1726_v49 = vmul.f32 %v1607_v41, %v1509_v16 }
 0x182   : > { %v566_v10 = vrot.slane %v560_v48, 2  ;;  %v2174_v63 = vrot.slane %v1726_v49, 2  ;;  %v1775_v48 = vsel %vm402_vm4, %v713_v20, %v2169_v6  ;;  %v340_v6 = vmul.f32 %v1623_v46, %v1509_v16 }
 0x184   : > { %762 = vrot.lane.b32.xlu1 %v757_v1, %s2206_s21  ;;  %515 = vrot.lane.b32.xlu0 %v512_v5, %s2206_s21  ;;  %v2170_v1 = vrot.slane %v1706_v22, 2  ;;  %v385_v5 = vrot.slane %v378_v29, 1  ;;  %v1763_v29 = vmul.f32 %v1594_v37, %v1481_v9  ;;  %v635_v37 = vmul.f32 %v1615_v43, %v1481_v9 }
 0x186   : > { %v1759_v24 = vsel %vm402_vm4, %v566_v10, %v2170_v1  ;;  %v1809_v10 = vmul.f32 %v1620_v45, %v1509_v16  ;;  %v641_v1 = vrot.slane %v635_v37, 1 }
 0x188   : > { %481 = vrot.lane.b32.xlu1 %v476_v2, %s2207_s3  ;;  %662 = vrot.lane.b32.xlu0 %v659_v19, %s2206_s21  ;;  %v679_v2 = vsel %vm345_vm3, %v677_v44, %v2172_v23  ;;  %v826_v19 = vsel %vm345_vm3, %v824_v62, %v2171_v53  ;;  %v1770_v44 = vsel %vm345_vm3, %v383_v54, %v385_v5  ;;  %v789_v14 = vrot.slane %v1809_v10, 1 }
 0x189   : > { %v1797_v5 = vmul.f32 %v1612_v42, %v1509_v16 }
 0x18b   : > { %v495_v20 = vrot.slane %v1797_v5, 1 }
 0x18c   : > { %628 = vrot.lane.b32.xlu1 %v623_v7, %s2207_s3  ;;  %809 = vrot.lane.b32.xlu0 %v806_v35, %s2206_s21  ;;  %v1754_v7 = vsel %vm345_vm3, %v382_v4, %v383_v54  ;;  %v883_v35 = vrot.slane %v876_v15, 2  ;;  %v488_v4 = vmul.f32 %v1612_v42, %v1481_v9 }
 0x18e   : > { %v1791_v62 = vsel %vm402_vm4, %v2174_v63, %v883_v35  ;;  %v494_v15 = vrot.slane %v488_v4, 1  ;;  %v339_v35 = vmul.f32 %v1623_v46, %v1481_v9  ;;  %v347_v63 = vrot.slane %v340_v6, 1 }
 0x18f   : > { %v691_v6 = vmul.f32 %v1639_v51, %v1481_v9  ;;  %v692_v46 = vmul.f32 %v1639_v51, %v1509_v16 }
 0x190   : > { %775 = vrot.lane.b32.xlu1 %v770_v12, %s2207_s3  ;;  %535 = vrot.lane.b32.xlu0 %v532_v58, %s2207_s3  ;;  %v1803_v12 = vmul.f32 %v1615_v43, %v1509_v16  ;;  %v782_v58 = vmul.f32 %v1620_v45, %v1481_v9  ;;  %v1821_v4 = vsel %vm345_vm3, %v494_v15, %v495_v20  ;;  %v346_v5 = vrot.slane %v339_v35, 1 }
 0x191   : > { %v397_v15 = vmul.f32 %v1647_v55, %v1509_v16  ;;  %v697_v35 = vrot.slane %v691_v6, 2 }
 0x192   : > { %v642_v53 = vrot.slane %v1803_v12, 1  ;;  %v788_v23 = vrot.slane %v782_v58, 1  ;;  %v544_v12 = vmul.f32 %v1626_v47, %v1481_v9  ;;  %v349_v58 = vrot.slane %v341_v11, 1 }
 0x193   : > { %v404_v54 = vrot.slane %v397_v15, 2 }
 0x194   : > { %367 = vrot.lane.b32.xlu1 %v364_v60, %s2206_s21  ;;  %682 = vrot.lane.b32.xlu0 %v679_v2, %s2207_s3  ;;  %v1826_v3 = vsel %vm345_vm3, %v641_v1, %v642_v53  ;;  %v1829_v37 = vsel %vm345_vm3, %v788_v23, %v789_v14  ;;  %v545_v60 = vmul.f32 %v1626_v47, %v1509_v16  ;;  %v550_v1 = vrot.slane %v544_v12, 2 }
 0x195   : > { %2208 = vst [vmem:[#allocation22_spill] sm:$0xff] %v1829_v37  ;;  %v1836_v2 = vsel %vm345_vm3, %v346_v5, %v347_v63  ;;  %v396_v23 = vmul.f32 %v1647_v55, %v1481_v9  ;;  %v1849_v11 = vsel %vm345_vm3, %v347_v63, %v349_v58  ;;  %v698_v5 = vrot.slane %v692_v46, 2 }
 0x196   : > { %v551_v10 = vrot.slane %v545_v60, 2  ;;  %v839_v37 = vmul.f32 %v1659_v59, %v1509_v16  ;;  %v490_v58 = vmul.f32 %v1612_v42, %v1669_v0  ;;  %v844_v46 = vrot.slane %v838_v52, 2 }
 0x197   : > { %v403_v60 = vrot.slane %v396_v23, 2  ;;  %v1862_v63 = vsel %vm402_vm4, %v697_v35, %v698_v5  ;;  %v637_v23 = vmul.f32 %v1615_v43, %v1669_v0  ;;  %v546_v42 = vmul.f32 %v1626_v47, %v1669_v0 }
 0x198   : > { %369 = vrot.lane.b32.xlu1 %v366_v18, %s2206_s21  ;;  %829 = vrot.lane.b32.xlu0 %v826_v19, %s2207_s3  ;;  %v1854_v12 = vsel %vm402_vm4, %v550_v1, %v551_v10  ;;  %v861_v18 = vrot.slane %v1779_v32, 2  ;;  %v398_v19 = vmul.f32 %v1647_v55, %v1669_v0  ;;  %v845_v1 = vrot.slane %v839_v37, 2 }
 0x199   : > { %v1869_v6 = vsel %vm402_vm4, %v403_v60, %v404_v54  ;;  %v497_v35 = vrot.slane %v490_v58, 1  ;;  %v784_v55 = vmul.f32 %v1620_v45, %v1669_v0  ;;  %v644_v37 = vrot.slane %v637_v23, 1 }
 0x19a   : > { %v406_v15 = vrot.slane %v398_v19, 2  ;;  %v1882_v52 = vsel %vm402_vm4, %v844_v46, %v845_v1  ;;  %v693_v43 = vmul.f32 %v1639_v51, %v1669_v0  ;;  %v553_v47 = vrot.slane %v546_v42, 2 }
 0x19b   : > { %v1894_v45 = vsel %vm345_vm3, %v495_v20, %v497_v35  ;;  %v791_v60 = vrot.slane %v784_v55, 1  ;;  %v1898_v19 = vmul.f32 %v1604_v40, %v1509_v16  ;;  %v1901_v51 = vsel %vm345_vm3, %v642_v53, %v644_v37 }
 0x19c   : > { %387 = vrot.lane.b32.xlu1 %v1754_v7, %s2207_s3  ;;  %571 = vrot.lane.b32.xlu0 %v1759_v24, %s2206_s21  ;;  %v840_v7 = vmul.f32 %v1659_v59, %v1669_v0  ;;  %v1891_v24 = vsel %vm402_vm4, %v404_v54, %v406_v15  ;;  %v700_v58 = vrot.slane %v693_v43, 2  ;;  %v419_v54 = vrot.slane %v1763_v29, 2 }
 0x19d   : > { %v1909_v20 = vsel %vm345_vm3, %v789_v14, %v791_v60  ;;  %v1912_v46 = vsel %vm402_vm4, %v551_v10, %v553_v47  ;;  %v860_v23 = vrot.slane %v1767_v21, 2  ;;  %v433_v53 = vmul.f32 %v1604_v40, %v1481_v9 }
 0x19e   : > { %v847_v59 = vrot.slane %v840_v7, 2  ;;  %v1918_v15 = vsel %vm402_vm4, %v698_v5, %v700_v58  ;;  %v422_v29 = vrot.slane %v1783_v57, 2  ;;  %v506_v14 = vmul.f32 %v1558_v25, %v1669_v0 }
 0x19f   : > { %v2209_v10 = vrot.slane %v1744_v13, 2  ;;  %v862_v35 = vsel %vm402_vm4, %v860_v23, %v861_v18  ;;  %v440_v5 = vrot.slane %v1898_v19, 2  ;;  %v439_v25 = vrot.slane %v433_v53, 2 }
 0x1a0   : > { %389 = vrot.lane.b32.xlu1 %v1770_v44, %s2207_s3  ;;  %718 = vrot.lane.b32.xlu0 %v1775_v48, %s2206_s21  ;;  %v1921_v44 = vsel %vm402_vm4, %v845_v1, %v847_v59  ;;  %v1927_v48 = vstv %s1859_s0  ;;  %v513_v37 = vrot.slane %v506_v14, 1  ;;  %v726_v43 = vstv %s1888_s1 }
 0x1a1   : > { %v421_v21 = vsel %vm402_vm4, %v419_v54, %v2209_v10  ;;  %v1938_v1 = vmul.f32 %v1927_v48, %v1509_v16  ;;  %v580_v57 = vmul.f32 %v1927_v48, %v1481_v9  ;;  %v2210_v55 = vmov %v2209_v10 }
 0x1a2   : > { %v423_v42 = vsel %vm402_vm4, %v2210_v55, %v422_v29  ;;  %v441_v7 = vsel %vm402_vm4, %v439_v25, %v440_v5  ;;  %v653_v47 = vmul.f32 %v1561_v26, %v1669_v0  ;;  %v728_v58 = vmul.f32 %v726_v43, %v1509_v16 }
 0x1a3   : > { %v587_v60 = vrot.slane %v1938_v1, 2  ;;  %v586_v13 = vrot.slane %v580_v57, 2  ;;  %v727_v59 = vmul.f32 %v726_v43, %v1481_v9  ;;  %v2211_v54 = vrot.slane %v1598_v38, 1 }
 0x1a4   : > { %424 = vrot.lane.b32.xlu1 %v421_v21, %s2206_s21  ;;  %865 = vrot.lane.b32.xlu0 %v862_v35, %s2206_s21  ;;  %v660_v29 = vrot.slane %v653_v47, 1  ;;  %v734_v14 = vrot.slane %v728_v58, 2  ;;  %v800_v26 = vmul.f32 %v1564_v27, %v1669_v0  ;;  %v874_v21 = vmul.f32 %v1607_v41, %v1481_v9 }
 0x1a5   : > { %v514_v23 = vsel %vm345_vm3, %v2211_v54, %v513_v37  ;;  %v588_v53 = vsel %vm402_vm4, %v586_v13, %v587_v60  ;;  %v733_v10 = vrot.slane %v727_v59, 2  ;;  %v2212_v35 = vrot.slane %v1636_v50, 1 }
 0x1a6   : > { %v807_v25 = vrot.slane %v800_v26, 1  ;;  %v526_v57 = vmul.f32 %v1571_v28, %v1669_v0  ;;  %v880_v27 = vrot.slane %v874_v21, 2  ;;  %v2213_v55 = vrot.slane %v1653_v56, 1 }
 0x1a7   : > { %v661_v38 = vsel %vm345_vm3, %v2212_v35, %v660_v29  ;;  %v735_v1 = vsel %vm402_vm4, %v733_v10, %v734_v14  ;;  %v2214_v41 = vrot.slane %v1726_v49, 2  ;;  %v2215_v28 = vrot.slane %v1663_v61, 1 }
 0x1a8   : > { %426 = vrot.lane.b32.xlu1 %v423_v42, %s2206_s21  ;;  %444 = vrot.lane.b32.xlu0 %v441_v7, %s2207_s3  ;;  %v808_v42 = vsel %vm345_vm3, %v2213_v55, %v807_v25  ;;  %v533_v37 = vrot.slane %v526_v57, 1  ;;  %v673_v7 = vmul.f32 %v1577_v30, %v1669_v0  ;;  %v820_v56 = vmul.f32 %v1580_v31, %v1669_v0 }
 0x1a9   : > { %v882_v50 = vsel %vm402_vm4, %v880_v27, %v2214_v41  ;;  %v2216_v49 = vrot.slane %v1685_v8, 1  ;;  %v562_v30 = vmul.f32 %v1586_v33, %v1669_v0  ;;  %v2217_v61 = vrot.slane %v1697_v17, 1 }
 0x1aa   : > { %v534_v47 = vsel %vm345_vm3, %v2215_v28, %v533_v37  ;;  %v680_v58 = vrot.slane %v673_v7, 1  ;;  %v827_v59 = vrot.slane %v820_v56, 1  ;;  %v709_v31 = vmul.f32 %v1591_v36, %v1669_v0 }
 0x1ab   : > { %v2218_v8 = vrot.slane %v1706_v22, 2  ;;  %v856_v33 = vmul.f32 %v1601_v39, %v1669_v0  ;;  %v2219_v17 = vrot.slane %v1715_v34, 2  ;;  %v435_v36 = vmul.f32 %v1604_v40, %v1669_v0 }
 0x1ac   : > { %517 = vrot.lane.b32.xlu1 %v514_v23, %s2206_s21  ;;  %591 = vrot.lane.b32.xlu0 %v588_v53, %s2207_s3  ;;  %v681_v13 = vsel %vm345_vm3, %v2216_v49, %v680_v58  ;;  %v828_v54 = vsel %vm345_vm3, %v2217_v61, %v827_v59  ;;  %v569_v23 = vrot.slane %v562_v30, 2  ;;  %v716_v29 = vrot.slane %v709_v31, 2 }
 0x1ad   : > { %v863_v10 = vrot.slane %v856_v33, 2  ;;  %v442_v21 = vrot.slane %v435_v36, 2  ;;  %v582_v39 = vmul.f32 %v1927_v48, %v1669_v0  ;;  %v309_v48 = vstv %s269_s2 }
 0x1ae   : > { %v570_v53 = vsel %vm402_vm4, %v2218_v8, %v569_v23  ;;  %v717_v26 = vsel %vm402_vm4, %v2219_v17, %v716_v29  ;;  %v310_v19 = vmul.f32 %v309_v48, %v1481_v9  ;;  %v458_v27 = vstv %s1029_s12 }
 0x1af   : > { %v864_v22 = vsel %vm402_vm4, %v861_v18, %v863_v10  ;;  %v443_v34 = vsel %vm402_vm4, %v440_v5, %v442_v21  ;;  %v589_v35 = vrot.slane %v582_v39, 2  ;;  %v752_v49 = vstv %s1047_s14 }
 0x1b0   : > { %664 = vrot.lane.b32.xlu1 %v661_v38, %s2206_s21  ;;  %738 = vrot.lane.b32.xlu0 %v735_v1, %s2207_s3  ;;  %v729_v38 = vmul.f32 %v726_v43, %v1669_v0  ;;  %v753_v23 = vmul.f32 %v752_v49, %v1481_v9 }
 0x1b1   : > { %v590_v40 = vsel %vm402_vm4, %v587_v60, %v589_v35 }
 0x1b2   : > { %v736_v32 = vrot.slane %v729_v38, 2 }
 0x1b4   : > { %811 = vrot.lane.b32.xlu1 %v808_v42, %s2206_s21  ;;  %885 = vrot.lane.b32.xlu0 %v882_v50, %s2207_s3  ;;  %v737_v18 = vsel %vm402_vm4, %v734_v14, %v736_v32  ;;  %v311_v14 = vmul.f32 %v309_v48, %v1509_v16  ;;  %v605_v50 = vstv %s1038_s13 }
 0x1b5   : > { %v607_v29 = vmul.f32 %v605_v50, %v1509_v16 }
 0x1b8   : > { %537 = vrot.lane.b32.xlu1 %v534_v47, %s2207_s3  ;;  %v606_v47 = vmul.f32 %v605_v50, %v1481_v9 }
 0x1bc   : > { %684 = vrot.lane.b32.xlu1 %v681_v13, %s2207_s3 }
 0x1c0   : > { %831 = vrot.lane.b32.xlu1 %v828_v54, %s2207_s3 }
 0x1c4   : > { %573 = vrot.lane.b32.xlu1 %v570_v53, %s2206_s21 }
 0x1c8   : > { %720 = vrot.lane.b32.xlu1 %v717_v26, %s2206_s21 }
 0x1cc   : > { %867 = vrot.lane.b32.xlu1 %v864_v22, %s2206_s21  ;;  %v754_v22 = vmul.f32 %v752_v49, %v1509_v16  ;;  %s2066_s21 = sld [smem:[#allocation8 + $0x2]] }
 0x1d0   : > { %446 = vrot.lane.b32.xlu1 %v443_v34, %s2207_s3 }
 0x1d4   : > { %593 = vrot.lane.b32.xlu1 %v590_v40, %s2207_s3 }
 0x1d8   : > { %740 = vrot.lane.b32.xlu1 %v737_v18, %s2207_s3 }
 0x1dc   : > { %887 = vrot.lane.b32.xlu1 %v1791_v62, %s2207_s3  ;;  %v459_v62 = vmul.f32 %v458_v27, %v1481_v9  ;;  %s2059_s3 = sld [smem:[#allocation8]] }
 0x1de   : > { %v331_v0 = vpop.permute.xlu1 %330  ;;  %v318_v5 = vpop.permute.xlu0 %317 }
 0x1df   : > { %v323_v43 = vadd.f32 %v318_v5, %v310_v19 }
 0x1e1   : > { %v336_v1 = vadd.f32 %v331_v0, %v323_v43 }
 0x1e2   : > { %v467_v60 = vpop.permute.xlu1 %466  ;;  %v614_v25 = vpop.permute.xlu0 %613 }
 0x1e3   : > { %v353_v57 = vadd.f32 %v1836_v2, %v336_v1  ;;  %v472_v37 = vadd.f32 %v467_v60, %v459_v62  ;;  %v619_v13 = vadd.f32 %v614_v25, %v606_v47  ;;  %v460_v2 = vmul.f32 %v458_v27, %v1509_v16 }
 0x1e6   : > { %v320_v55 = vpop.permute.xlu1 %319  ;;  %v761_v42 = vpop.permute.xlu0 %760 }
 0x1e7   : > { %v324_v41 = vadd.f32 %v320_v55, %v311_v14  ;;  %v766_v53 = vadd.f32 %v761_v42, %v753_v23 }
 0x1ea   : > { %v333_v7 = vpop.permute.xlu1 %332  ;;  %v480_v28 = vpop.permute.xlu0 %479 }
 0x1eb   : > { %v337_v58 = vadd.f32 %v333_v7, %v324_v41  ;;  %v485_v56 = vadd.f32 %v480_v28, %v472_v37 }
 0x1ed   : > { %v501_v59 = vadd.f32 %v1821_v4, %v485_v56  ;;  %v354_v30 = vadd.f32 %v1849_v11, %v337_v58  ;;  %v2220_v4 = vld [vmem:[#allocation22_spill] sm:$0xff] }
 0x1ee   : > { %v469_v61 = vpop.permute.xlu1 %468  ;;  %v627_v54 = vpop.permute.xlu0 %626 }
 0x1ef   : > { %v473_v31 = vadd.f32 %v469_v61, %v460_v2  ;;  %v632_v8 = vadd.f32 %v627_v54, %v619_v13 }
 0x1f1   : > { %v648_v33 = vadd.f32 %v1826_v3, %v632_v8 }
 0x1f2   : > { %v616_v17 = vpop.permute.xlu1 %615  ;;  %v774_v26 = vpop.permute.xlu0 %773 }
 0x1f3   : > { %v620_v10 = vadd.f32 %v616_v17, %v607_v29  ;;  %v779_v36 = vadd.f32 %v774_v26, %v766_v53  ;;  %v746_v17 = vstv %s2066_s21 }
 0x1f5   : > { %v795_v21 = vadd.f32 %v2220_v4, %v779_v36 }
 0x1f6   : > { %v763_v11 = vpop.permute.xlu1 %762  ;;  %v516_v39 = vpop.permute.xlu0 %515 }
 0x1f7   : > { %v767_v34 = vadd.f32 %v763_v11, %v754_v22  ;;  %v521_v48 = vadd.f32 %v516_v39, %v501_v59  ;;  %v452_v59 = vstv %s2059_s3 }
 0x1fa   : > { %v482_v35 = vpop.permute.xlu1 %481  ;;  %v663_v9 = vpop.permute.xlu0 %662 }
 0x1fb   : > { %v486_v38 = vadd.f32 %v482_v35, %v473_v31  ;;  %v668_v1 = vadd.f32 %v663_v9, %v648_v33  ;;  %v599_v31 = vstv %s2062_s15 }
 0x1fd   : > { %v2047_v40 = vadd.f32 %v1894_v45, %v486_v38 }
 0x1fe   : > { %v629_v32 = vpop.permute.xlu1 %628  ;;  %v810_v18 = vpop.permute.xlu0 %809 }
 0x1ff   : > { %v633_v3 = vadd.f32 %v629_v32, %v620_v10  ;;  %v815_v55 = vadd.f32 %v810_v18, %v795_v21  ;;  %v893_v21 = vstv %s2069_s25 }
 0x201   : > { %v2050_v19 = vadd.f32 %v1901_v51, %v633_v3 }
 0x202   : > { %v776_v0 = vpop.permute.xlu1 %775  ;;  %v536_v16 = vpop.permute.xlu0 %535 }
 0x203   : > { %v780_v5 = vadd.f32 %v776_v0, %v767_v34  ;;  %v541_v43 = vadd.f32 %v536_v16, %v521_v48 }
 0x205   : > { %v557_v60 = vadd.f32 %v1854_v12, %v541_v43  ;;  %v2054_v25 = vadd.f32 %v1909_v20, %v780_v5 }
 0x206   : > { %v368_v27 = vpop.permute.xlu1 %367  ;;  %v683_v45 = vpop.permute.xlu0 %682 }
 0x207   : > { %v688_v14 = vadd.f32 %v683_v45, %v668_v1  ;;  %v373_v50 = vadd.f32 %v368_v27, %v353_v57 }
 0x209   : > { %v704_v42 = vadd.f32 %v1862_v63, %v688_v14 }
 0x20a   : > { %v370_v62 = vpop.permute.xlu1 %369  ;;  %v830_v41 = vpop.permute.xlu0 %829 }
 0x20b   : > { %v835_v51 = vadd.f32 %v830_v41, %v815_v55  ;;  %v374_v12 = vadd.f32 %v370_v62, %v354_v30 }
 0x20d   : > { %v851_v37 = vadd.f32 %v1882_v52, %v835_v51 }
 0x20e   : > { %v388_v7 = vpop.permute.xlu1 %387  ;;  %v572_v28 = vpop.permute.xlu0 %571 }
 0x20f   : > { %v393_v47 = vadd.f32 %v388_v7, %v373_v50  ;;  %v577_v61 = vadd.f32 %v572_v28, %v557_v60 }
 0x211   : > { %v410_v20 = vadd.f32 %v1869_v6, %v393_v47 }
 0x212   : > { %v390_v58 = vpop.permute.xlu1 %389  ;;  %v719_v56 = vpop.permute.xlu0 %718 }
 0x213   : > { %v394_v49 = vadd.f32 %v390_v58, %v374_v12  ;;  %v724_v53 = vadd.f32 %v719_v56, %v704_v42 }
 0x215   : > { %v411_v63 = vadd.f32 %v1891_v24, %v394_v49 }
 0x216   : > { %v425_v13 = vpop.permute.xlu1 %424  ;;  %v866_v2 = vpop.permute.xlu0 %865 }
 0x217   : > { %v430_v52 = vadd.f32 %v425_v13, %v410_v20  ;;  %v871_v36 = vadd.f32 %v866_v2, %v851_v37 }
 0x21a   : > { %v427_v57 = vpop.permute.xlu1 %426  ;;  %v445_v30 = vpop.permute.xlu0 %444 }
 0x21b   : > { %v450_v6 = vadd.f32 %v445_v30, %v430_v52  ;;  %v431_v45 = vadd.f32 %v427_v57, %v411_v63 }
 0x21d   : > { %v453_v54 = vadd.f32 %v452_v59, %v450_v6 }
 0x21e   : > { %v518_v23 = vpop.permute.xlu1 %517  ;;  %v592_v24 = vpop.permute.xlu0 %591 }
 0x21f   : > { %456 = vst.msk [vmem:[%s2071_s4] sm:$0xff] %vm455_vm5, %v453_v54  ;;  %v597_v8 = vadd.f32 %v592_v24, %v577_v61  ;;  %v522_v34 = vadd.f32 %v518_v23, %v2047_v40 }
 0x221   : > { %v600_v29 = vadd.f32 %v599_v31, %v597_v8 }
 0x222   : > { %v665_v33 = vpop.permute.xlu1 %664  ;;  %v739_v26 = vpop.permute.xlu0 %738 }
 0x223   : > { %1059 = vst.msk [vmem:[%s2071_s4 + $0x10] sm:$0xff] %vm455_vm5, %v600_v29  ;;  %v744_v10 = vadd.f32 %v739_v26, %v724_v53  ;;  %v669_v32 = vadd.f32 %v665_v33, %v2050_v19 }
 0x225   : > { %v747_v22 = vadd.f32 %v746_v17, %v744_v10 }
 0x226   : > { %v812_v4 = vpop.permute.xlu1 %811  ;;  %v886_v11 = vpop.permute.xlu0 %885 }
 0x227   : > { %1061 = vst.msk [vmem:[%s2071_s4 + $0x20] sm:$0xff] %vm455_vm5, %v747_v22  ;;  %v891_v39 = vadd.f32 %v886_v11, %v871_v36  ;;  %v816_v0 = vadd.f32 %v812_v4, %v2054_v25 }
 0x229   : > { %v894_v35 = vadd.f32 %v893_v21, %v891_v39 }
 0x22a   : > { %v538_v9 = vpop.permute.xlu1 %537 }
 0x22b   : > { %1063 = vst.msk [vmem:[%s2071_s4 + $0x30] sm:$0xff] %vm455_vm5, %v894_v35  ;;  %v542_v38 = vadd.f32 %v538_v9, %v522_v34 }
 0x22d   : > { %v558_v18 = vadd.f32 %v1912_v46, %v542_v38 }
 0x22e   : > { %v685_v3 = vpop.permute.xlu1 %684 }
 0x22f   : > { %v689_v48 = vadd.f32 %v685_v3, %v669_v32 }
 0x231   : > { %v705_v16 = vadd.f32 %v1918_v15, %v689_v48 }
 0x232   : > { %v832_v5 = vpop.permute.xlu1 %831 }
 0x233   : > { %v836_v43 = vadd.f32 %v832_v5, %v816_v0 }
 0x235   : > { %v852_v40 = vadd.f32 %v1921_v44, %v836_v43 }
 0x236   : > { %v574_v1 = vpop.permute.xlu1 %573 }
 0x237   : > { %v578_v14 = vadd.f32 %v574_v1, %v558_v18 }
 0x23a   : > { %v721_v60 = vpop.permute.xlu1 %720 }
 0x23b   : > { %v725_v25 = vadd.f32 %v721_v60, %v705_v16 }
 0x23e   : > { %v868_v27 = vpop.permute.xlu1 %867 }
 0x23f   : > { %v872_v51 = vadd.f32 %v868_v27, %v852_v40 }
 0x242   : > { %v447_v19 = vpop.permute.xlu1 %446 }
 0x243   : > { %v451_v46 = vadd.f32 %v447_v19, %v431_v45 }
 0x245   : > { %v454_v55 = vadd.f32 %v452_v59, %v451_v46 }
 0x246   : > { %v594_v42 = vpop.permute.xlu1 %593 }
 0x247   : > { %457 = vst.msk [vmem:[%s2071_s4 + $0x8] sm:$0xff] %vm455_vm5, %v454_v55  ;;  %v598_v15 = vadd.f32 %v594_v42, %v578_v14 }
 0x249   : > { %v601_v62 = vadd.f32 %v599_v31, %v598_v15 }
 0x24a   : > { %v741_v44 = vpop.permute.xlu1 %740 }
 0x24b   : > { %1060 = vst.msk [vmem:[%s2071_s4 + $0x18] sm:$0xff] %vm455_vm5, %v601_v62  ;;  %v745_v41 = vadd.f32 %v741_v44, %v725_v25 }
 0x24d   : > { %v748_v50 = vadd.f32 %v746_v17, %v745_v41 }
 0x24e   : > { %v888_v37 = vpop.permute.xlu1 %887 }
 0x24f   : > { %1062 = vst.msk [vmem:[%s2071_s4 + $0x28] sm:$0xff] %vm455_vm5, %v748_v50  ;;  %v892_v7 = vadd.f32 %v888_v37, %v872_v51 }
 0x251   : > { %v895_v28 = vadd.f32 %v893_v21, %v892_v7 }
 0x253   : > { %1064 = vst.msk [vmem:[%s2071_s4 + $0x38] sm:$0xff] %vm455_vm5, %v895_v28 }
 0x254   : > { %1220 = shalt.err (!%p1217_p7)
}
 0x255   : > { %s1221_s9 = scalar_lea.hbm %s2100_s22, 1024  ;;  %s1225_s7 = scalar_lea.hbm %s2221_s20, 2048 }
 0x256   : > { %p1222_p11 = scmp.ne.s32.totalorder %s2100_s22, %s1221_s9  ;;  %p1226_p6 = scmp.lt.u32.totalorder %s2100_s22, %s2221_s20 }
 0x257   : > { %p1227_p9 = scmp.lt.u32.totalorder %s1225_s7, %s1221_s9  ;;  %p1229_p5 = scmp.lt.u32.totalorder %s1221_s9, %s2100_s22 }
 0x258   : > { %p1223_p13 = pnand %p1222_p11, %p2222_p2 }
 0x259   : > { %p1228_p1 = por %p1227_p9, %p1226_p6 }
 0x25a   : > { %p1224_p3 = pneg %p1223_p13 }
 0x25b   : > { %p1230_p8 = por %p1229_p5, %p1228_p1 }
 0x25d   : > { %p1231_p10 = pnand %p1230_p8, %p1224_p3 }
 0x25f   : > { %1234 = shalt.err (!%p1231_p10)
}
 0x260   : > { %s1293_s0 = smov 128   ;;  %s1294_s1 = smov 8  }
 0x261   : > { %1082 = dma.vmem_to_hbm [thread:$0]  (%p2222_p2), %s2102_s11, 1024, %s2100_s22, %s900_s27, %s1293_s0, %s1293_s0, %s1294_s1  }
 0x262 PF: > { %s2223_s2 = sld [smem:[#allocation15_spill]]  ;;  %s2224_s12 = sld [smem:[#allocation21_spill]] }
 0x263   : > { %s2225_s13 = sld [smem:[#allocation18_spill]] }
 0x268   : > { %s928_s14 = sand.u32 1, %s2223_s2   ;;  %p2226_p4 = scmp.ne.s32.totalorder %s2224_s12, 0 }
 0x269   : > { %p2227_p12 = scmp.ge.s32.totalorder %s2225_s13, 2  ;;  %s929_s3 = scalar_lea.sflag [#allocation5], %s928_s14 }
 0x26b   : > { %p1096_p0 = pnand %p2227_p12, %p2226_p4 }
 0x26d   : > { %1264 = dma.done.wait (!%p1096_p0), %s929_s3, 1024  }
 0x26e   : > { %1266 = vsyncadd (!%p1096_p0), %s929_s3, 4294966272  ;;  %s2228_s15 = sld [smem:[#allocation19_spill]]  ;;  %s2229_s12 = sld [smem:[#allocation16_spill]] }
 0x26f   : > { %s2230_s13 = sld [smem:[#allocation17_spill]]  ;;  %s2231_s14 = sld [smem:[#allocation20_spill]] }
 0x274   : > { %p18_p7 = scmp.ge.s32.totalorder %s2228_s15, 4  }
 0x276   :  { %20 = sbr.rel (!%p18_p7) target bundleno = 12 (0xc), region = 89 }
 0x27d   :  { %934 = vsyncpa [#allocation4], 1 }
 0x27e   :  { %936 = vsyncpa [#allocation4 + $0x1], 1 }
 0x27f   :  { %937 = vsyncpa [#allocation5], 1 }
 0x280   :  { %939 = vsyncpa [#allocation5 + $0x1], 1 }
 0x281   :  { %940 = vsyncpa [#allocation6], 1 }
 0x282   :  { %942 = vsyncpa [#allocation6 + $0x1], 1 }
 0x283   :  { %943 = vsyncpa [#allocation9], 1 }

</bundles_post_ra>
